<compile_context>
chip_gen: v6e
topology: v6e:2x2x1
jax: 0.10.0
libtpu: 0.0.40
codegen_flags: <defaults>
</compile_context>

<pallas_src>
import jax
import jax.numpy as jnp
from jax.experimental import pallas as pl
from jax.experimental.pallas import tpu as pltpu


def scaled_linear_kernel(x_ref, w_ref, b_ref, o_ref):
    # Single MXU pass + same-shape VPU bias add (scale already folded into w).
    acc = jnp.dot(x_ref[...], w_ref[...], preferred_element_type=jnp.float32)
    o_ref[...] = (acc + b_ref[...]).astype(o_ref.dtype)


def prepare_params(weight, bias, batch_size):
    """One-time parameter setup (outside the per-call hot path).

    weight: (out_features, in_features) PyTorch layout.
    bias:   (out_features,).

    Returns:
      w_scaled_t: (in, out) = weight.T * 0.5  (scale folded in, bit-exact)
      b_tile:     (batch_size, out) bias pre-broadcast to the output tile.
    """
    w_scaled_t = jnp.asarray(weight).T * 0.5                     # (10, 5)
    b_tile = jnp.broadcast_to(jnp.asarray(bias).reshape(1, -1),
                              (batch_size, bias.shape[0]))       # (B, 5)
    return w_scaled_t, jnp.asarray(b_tile)


def my_model_forward(x, w_scaled_t, b_tile):
    """x: (B, 10) f32; w_scaled_t: (10, 5) f32; b_tile: (B, 5) f32."""
    B, K = x.shape
    N = w_scaled_t.shape[1]

    cost = pl.CostEstimate(
        flops=2 * B * K * N,
        transcendentals=0,
        bytes_accessed=(B * K + K * N + B * N + B * N) * 4,
    )

    return pl.pallas_call(
        scaled_linear_kernel,
        out_shape=jax.ShapeDtypeStruct((B, N), x.dtype),
        # Grid-less call: whole (tiny) arrays land in VMEM, no pipeline
        # prologue/epilogue, no index_map plumbing.
        in_specs=[
            pl.BlockSpec(memory_space=pltpu.MemorySpace.VMEM),
            pl.BlockSpec(memory_space=pltpu.MemorySpace.VMEM),
            pl.BlockSpec(memory_space=pltpu.MemorySpace.VMEM),
        ],
        out_specs=pl.BlockSpec(memory_space=pltpu.MemorySpace.VMEM),
        cost_estimate=cost,
    )(x, w_scaled_t, b_tile)


if __name__ == "__main__":
    key = jax.random.PRNGKey(0)
    kx, kw, kb = jax.random.split(key, 3)

    B, IN, OUT = 8, 10, 5
    x = jax.random.normal(kx, (B, IN), dtype=jnp.float32)
    # Deterministic parameter init (mimics nn.Linear uniform init bounds).
    bound = 1.0 / (IN ** 0.5)
    weight = jax.random.uniform(kw, (OUT, IN), minval=-bound, maxval=bound,
                                dtype=jnp.float32)
    bias = jax.random.uniform(kb, (OUT,), minval=-bound, maxval=bound,
                              dtype=jnp.float32)

    # One-time setup (hoisted out of the per-call path).
    w_scaled_t, b_tile = prepare_params(weight, bias, B)

    out = my_model_forward(x, w_scaled_t, b_tile)
    jax.block_until_ready(out)

    # Reference check in plain JAX against the original module semantics.
    ref = (x * 0.5) @ weight.T + bias
    assert jnp.allclose(out, ref, atol=1e-5, rtol=1e-5), "mismatch vs reference"
    print("KERNEL_OK")
</pallas_src>

<mosaic_0001>
module attributes {stable_mosaic.version = 11 : i64} {
  func.func @scaled_linear_kernel(%arg0: memref<8x10xf32, #tpu.memory_space<vmem>>, %arg1: memref<10x5xf32, #tpu.memory_space<vmem>>, %arg2: memref<8x5xf32, #tpu.memory_space<vmem>>, %arg3: memref<8x5xf32, #tpu.memory_space<vmem>>) attributes {dimension_semantics = [], scalar_prefetch = 0 : i64, scratch_operands = 0 : i64, tpu.core_type = #tpu.core_type<tc>} {
    %c0 = arith.constant 0 : index
    %c0_0 = arith.constant 0 : index
    %0 = vector.load %arg0[%c0, %c0_0] : memref<8x10xf32, #tpu.memory_space<vmem>>, vector<8x10xf32>
    %c0_1 = arith.constant 0 : index
    %c0_2 = arith.constant 0 : index
    %1 = vector.load %arg1[%c0_1, %c0_2] : memref<10x5xf32, #tpu.memory_space<vmem>>, vector<10x5xf32>
    %cst = arith.constant dense<0.000000e+00> : vector<8x5xf32>
    %2 = tpu.matmul %0, %1, %cst {dimension_numbers = #tpu.dot_dimension_numbers<[1], [0], [0], [1], [0, 0, 1, 1], [], []>} : vector<8x10xf32>, vector<10x5xf32>, vector<8x5xf32> -> vector<8x5xf32>
    %c0_3 = arith.constant 0 : index
    %c0_4 = arith.constant 0 : index
    %3 = vector.load %arg2[%c0_3, %c0_4] : memref<8x5xf32, #tpu.memory_space<vmem>>, vector<8x5xf32>
    %4 = arith.addf %2, %3 : vector<8x5xf32>
    %c0_5 = arith.constant 0 : index
    %c0_6 = arith.constant 0 : index
    %5 = vector.load %arg3[%c0_5, %c0_6] : memref<8x5xf32, #tpu.memory_space<vmem>>, vector<8x5xf32>
    tpu.vector_store %arg3[%c0_5, %c0_6], %4 {strides = array<i32>} : memref<8x5xf32, #tpu.memory_space<vmem>>, vector<8x5xf32>,
    return
  }
}

</mosaic_0001>

<bundles_post_ra>
// kernel: tpu_custom_call.1
= control target key start
LH: loop header
LB: loop body
LE: loop exit
PB: predicated region body
PF: predicated region fallthrough
CT: control target
= control target key end

     0   :  { %vm23_vm0 = vcmask 1041408   ;;  %v150_v1 = vmov 0.0   ;;  %vm151_vm1 = vmmov 0   ;;  %s188_s0 = inlined_call_operand.vmem [shape: f32[8,10], index: 0, kind: input, shape index: {}]   ;;  %s189_s1 = inlined_call_operand.vmem [shape: f32[10,5], index: 1, kind: input, shape index: {}]   ;;  %s190_s2 = inlined_call_operand.vmem [shape: f32[8,5], index: 2, kind: input, shape index: {}]   ;;  %s191_s3 = inlined_call_operand.hbm [shape: f32[8,5], index: 3, kind: output, shape index: {}]  }
   0x1   :  { %v17_v0 = vld [vmem:[%s189_s1 + $0x8] sm:$0x3]  ;;  %118 = vmatprep.subr.mxu0 %v150_v1  ;;  %v16_v2 = vld [vmem:[%s189_s1] sm:$0xff]  ;;  %122 = vmatprep.mubr.msk.f32.mxu0 %vm151_vm1, %v150_v1 }
   0x2   :  { %8 = vsyncpa [#allocation3], 0  ;;  %119 = vmatpush3.msk.msra.mxu0 %vm23_vm0, %v17_v0  ;;  %v15_v3 = vld [vmem:[%s188_s0] sm:$0xff]  ;;  %vm19_vm2 = vcmask 80896   ;;  %s152_s20 = smov [#allocation2]   ;;  %vm97_vm3 = vcmask 39936  }
   0x3   :  { %120 = vmatprep.subr.mxu0 %v150_v1  ;;  %v18_v4 = vld [vmem:[%s190_s2] sm:$0xff]  ;;  %s105_s21 = sshll.u32 %s152_s20, 4  ;;  %s106_s21 = int_to_ptr.vmem [resolvable:$true] %s105_s21 }
   0x4   :  { %121 = vmatpush3.msra.mxu0 %v16_v2  ;;  %s128_s1 = scalar_lea.vmem %s106_s21, 128  ;;  %p133_p1 = scmp.lt.s32.totalorder %s106_s21, %s106_s21 }
   0x5   :  { %123 = vmatmul.mubr.msk.f32.vlgmr.msra.gmra.mxu0 %vm19_vm2, %v15_v3  ;;  %p129_p0 = scmp.ne.s32.totalorder %s106_s21, %s128_s1  ;;  %p134_p2 = scmp.lt.s32.totalorder %s128_s1, %s128_s1 }
   0x7   :  { %p135_p3 = por %p134_p2, %p133_p1 }
   0x9   :  { %p136_p4 = pnand %p135_p3, %p129_p0 }
  0xc5   :  { %v93_v5 = vpop.f32.mrf.mxu0 }
  0xc6   :  { %v94_v6 = vadd.f32 %v93_v5, %v18_v4 }
  0xc7   :  { %v124_v7 = vpop.f32.mrf.mxu0 }
  0xc8   :  { %98 = vst.msk [vmem:[#allocation2] sm:$0xff] %vm97_vm3, %v94_v6 }
  0xc9   :  { %139 = shalt.err (!%p136_p4)
}
  0xca   :  { %108 = dma.vmem_to_hbm [thread:$0]  %s106_s21, 128, %s191_s3, [#allocation3]  }
  0xcb   :  { %148 = dma.done.wait [#allocation3], 128  }
  0xcc   :  { %149 = vsyncadd [#allocation3], 4294967168 }
  0xcd   :  { %112 = vsyncpa [#allocation3], 1 }

</bundles_post_ra>
